<compile_context>
chip_gen: v5e
topology: v5e:2x2
jax: 0.10.0
libtpu: 0.0.40
codegen_flags: <defaults>
</compile_context>

<pallas_src>
import jax
import jax.numpy as jnp
from jax.experimental import pallas as pl
from jax.experimental.pallas import tpu as pltpu

IN_DIM, H1, H2, OUT_DIM = 28 * 28, 128, 64, 10
H2_PAD, OUT_PAD = 128, 128              # lane-aligned intermediate / fc3 matmul widths
DEFAULT_TB = 1024                       # amortizes per-grid-step overhead; ~7 MB VMEM


def _mlp_kernel(x_ref, w1_ref, b1_ref, w2_ref, b2_ref, w3_ref, b3_ref, o_ref):
    # x tile: (TB, 784) f32 streamed from HBM; cast to bf16 here (hidden under DMA).
    x = x_ref[...].astype(jnp.bfloat16)
    h1 = jnp.dot(x, w1_ref[...], preferred_element_type=jnp.float32) + b1_ref[...]
    h1 = jnp.maximum(h1, 0.0)                                          # (TB, 128) f32
    h2 = jnp.dot(h1.astype(jnp.bfloat16), w2_ref[...],
                 preferred_element_type=jnp.float32) + b2_ref[...]
    h2 = jnp.maximum(h2, 0.0)                                          # (TB, 128) f32
    out = jnp.dot(h2.astype(jnp.bfloat16), w3_ref[...],
                  preferred_element_type=jnp.float32) + b3_ref[...]    # (TB, 128) f32
    o_ref[...] = out[:, :OUT_DIM].astype(o_ref.dtype)                  # narrow (TB, 10) store


def _pad2(a, rows, cols):
    return jnp.pad(a, ((0, rows - a.shape[0]), (0, cols - a.shape[1])))


def net_forward(x, params, tb=DEFAULT_TB):
    """x: any shape with trailing elements == 784 (e.g. (B,1,28,28)); returns (B,10) f32."""
    w1, b1, w2, b2, w3, b3 = params
    x2d = x.reshape(-1, IN_DIM).astype(jnp.float32)          # torch: x.view(-1, 784); no pad/copy
    B = x2d.shape[0]

    # Resident operands: bf16 weights (w2/w3 zero-padded on the H2 axis, w3 also on N
    # so the matmuls keep the proven 128-wide shapes), f32 biases.
    w1_b = w1.astype(jnp.bfloat16)                                               # (784, 128)
    b1_p = b1.reshape(1, H1).astype(jnp.float32)
    w2_p = _pad2(w2, H1, H2_PAD).astype(jnp.bfloat16)                            # (128, 128)
    b2_p = jnp.pad(b2.reshape(1, H2), ((0, 0), (0, H2_PAD - H2))).astype(jnp.float32)
    w3_p = _pad2(w3, H2_PAD, OUT_PAD).astype(jnp.bfloat16)                       # (128, 128)
    b3_p = jnp.pad(b3.reshape(1, OUT_DIM),
                   ((0, 0), (0, OUT_PAD - OUT_DIM))).astype(jnp.float32)

    # Batch tile: multiple of 8 (f32 sublane), capped at ceil(B/2) so there are
    # >= 2 grid steps whenever possible (keeps both v7x TensorCores busy).
    half = (B + 1) // 2
    tb_cap = max(8, ((half + 7) // 8) * 8)
    tb_eff = max(8, (min(tb, tb_cap) // 8) * 8)
    n_tiles = pl.cdiv(B, tb_eff)
    b_pad = n_tiles * tb_eff
    x_in = x2d if b_pad == B else jnp.pad(x2d, ((0, b_pad - B), (0, 0)))

    weight_bytes = (w1_b.size + w2_p.size + w3_p.size) * 2 \
        + (b1_p.size + b2_p.size + b3_p.size) * 4
    cost = pl.CostEstimate(
        flops=2 * b_pad * (IN_DIM * H1 + H1 * H2_PAD + H2_PAD * OUT_PAD),
        transcendentals=0,
        bytes_accessed=b_pad * IN_DIM * 4 + b_pad * OUT_DIM * 4 + weight_bytes,
    )

    out = pl.pallas_call(
        _mlp_kernel,
        out_shape=jax.ShapeDtypeStruct((b_pad, OUT_DIM), jnp.float32),
        grid=(n_tiles,),
        in_specs=[
            pl.BlockSpec((tb_eff, IN_DIM), lambda i: (i, 0)),    # streamed f32 activations
            pl.BlockSpec((IN_DIM, H1), lambda i: (0, 0)),        # resident weights / biases
            pl.BlockSpec((1, H1), lambda i: (0, 0)),
            pl.BlockSpec((H1, H2_PAD), lambda i: (0, 0)),
            pl.BlockSpec((1, H2_PAD), lambda i: (0, 0)),
            pl.BlockSpec((H2_PAD, OUT_PAD), lambda i: (0, 0)),
            pl.BlockSpec((1, OUT_PAD), lambda i: (0, 0)),
        ],
        out_specs=pl.BlockSpec((tb_eff, OUT_DIM), lambda i: (i, 0)),   # narrow 10-wide output
        compiler_params=pltpu.CompilerParams(
            dimension_semantics=("parallel",),
            vmem_limit_bytes=32 * 1024 * 1024,
        ),
        cost_estimate=cost,
    )(x_in, w1_b, b1_p, w2_p, b2_p, w3_p, b3_p)

    return out[:B]   # row trim only (keep this if b_pad != B); columns are already 10


def init_params(key):
    """Deterministic init matching torch.nn.Linear default (U(-1/sqrt(in), 1/sqrt(in)))."""
    def linear(key, fan_in, fan_out):
        kw, kb = jax.random.split(key)
        bound = 1.0 / jnp.sqrt(float(fan_in))
        w = jax.random.uniform(kw, (fan_in, fan_out), jnp.float32, -bound, bound)
        b = jax.random.uniform(kb, (fan_out,), jnp.float32, -bound, bound)
        return w, b

    k1, k2, k3 = jax.random.split(key, 3)
    w1, b1 = linear(k1, IN_DIM, H1)
    w2, b2 = linear(k2, H1, H2)
    w3, b3 = linear(k3, H2, OUT_DIM)
    return (w1, b1, w2, b2, w3, b3)


def _reference(x, params):
    """Plain-JAX reference with the same bf16 operand rounding as the kernel."""
    w1, b1, w2, b2, w3, b3 = params
    f32 = jnp.float32
    xb = x.reshape(-1, IN_DIM).astype(jnp.bfloat16).astype(f32)
    w1b = w1.astype(jnp.bfloat16).astype(f32)
    w2b = w2.astype(jnp.bfloat16).astype(f32)
    w3b = w3.astype(jnp.bfloat16).astype(f32)
    h1 = jnp.maximum(xb @ w1b + b1.reshape(1, -1), 0.0)
    h2 = jnp.maximum(h1.astype(jnp.bfloat16).astype(f32) @ w2b + b2.reshape(1, -1), 0.0)
    return h2.astype(jnp.bfloat16).astype(f32) @ w3b + b3.reshape(1, -1)


if __name__ == "__main__":
    key = jax.random.PRNGKey(0)
    pkey, xkey = jax.random.split(key)
    params = init_params(pkey)

    # Small MNIST-like batch: (B, 1, 28, 28) -> flattened inside forward.
    x = jax.random.normal(xkey, (8, 1, 28, 28), dtype=jnp.float32)
    out = net_forward(x, params)
    jax.block_until_ready(out)
    assert out.shape == (8, OUT_DIM)
    assert jnp.allclose(out, _reference(x, params), atol=1e-2, rtol=1e-2)

    # Batch-tiled grid path with explicit small tile (B=40, TB=16 -> 3 tiles + row pad).
    x2 = jax.random.normal(jax.random.PRNGKey(1), (40, 1, 28, 28), dtype=jnp.float32)
    out2 = net_forward(x2, params, tb=16)
    jax.block_until_ready(out2)
    assert out2.shape == (40, OUT_DIM)
    assert jnp.allclose(out2, _reference(x2, params), atol=1e-2, rtol=1e-2)

    # Default tile with the ceil(B/2) cap -> 2 grid steps (exercises the v7x split path).
    out3 = net_forward(x2, params)
    jax.block_until_ready(out3)
    assert out3.shape == (40, OUT_DIM)
    assert jnp.allclose(out3, _reference(x2, params), atol=1e-2, rtol=1e-2)

    print("KERNEL_OK")
</pallas_src>

<mosaic_0001>
module attributes {stable_mosaic.version = 11 : i64} {
  func.func @_mlp_kernel(%arg0: i32, %arg1: memref<8x784xf32, #tpu.memory_space<vmem>>, %arg2: memref<784x128xbf16, #tpu.memory_space<vmem>>, %arg3: memref<1x128xf32, #tpu.memory_space<vmem>>, %arg4: memref<128x128xbf16, #tpu.memory_space<vmem>>, %arg5: memref<1x128xf32, #tpu.memory_space<vmem>>, %arg6: memref<128x128xbf16, #tpu.memory_space<vmem>>, %arg7: memref<1x128xf32, #tpu.memory_space<vmem>>, %arg8: memref<8x10xf32, #tpu.memory_space<vmem>>) attributes {dimension_semantics = [#tpu.dimension_semantics<parallel>], iteration_bounds = array<i64: 1>, scalar_prefetch = 0 : i64, scratch_operands = 0 : i64, tpu.core_type = #tpu.core_type<tc>, window_params = [{transform_indices = @transform_0, window_bounds = array<i64: 8, 784>}, {pipeline_mode = #tpu.pipeline_mode<synchronous>, transform_indices = @transform_1, window_bounds = array<i64: 784, 128>}, {pipeline_mode = #tpu.pipeline_mode<synchronous>, transform_indices = @transform_2, window_bounds = array<i64: 1, 128>}, {pipeline_mode = #tpu.pipeline_mode<synchronous>, transform_indices = @transform_3, window_bounds = array<i64: 128, 128>}, {pipeline_mode = #tpu.pipeline_mode<synchronous>, transform_indices = @transform_4, window_bounds = array<i64: 1, 128>}, {pipeline_mode = #tpu.pipeline_mode<synchronous>, transform_indices = @transform_5, window_bounds = array<i64: 128, 128>}, {pipeline_mode = #tpu.pipeline_mode<synchronous>, transform_indices = @transform_6, window_bounds = array<i64: 1, 128>}, {transform_indices = @transform_7, window_bounds = array<i64: 8, 10>}]} {
    %c0 = arith.constant 0 : index
    %c0_0 = arith.constant 0 : index
    %0 = vector.load %arg1[%c0, %c0_0] : memref<8x784xf32, #tpu.memory_space<vmem>>, vector<8x784xf32>
    %1 = arith.truncf %0 : vector<8x784xf32> to vector<8x784xbf16>
    %c0_1 = arith.constant 0 : index
    %c0_2 = arith.constant 0 : index
    %2 = vector.load %arg2[%c0_1, %c0_2] : memref<784x128xbf16, #tpu.memory_space<vmem>>, vector<784x128xbf16>
    %cst = arith.constant dense<0.000000e+00> : vector<8x128xf32>
    %3 = tpu.matmul %1, %2, %cst {dimension_numbers = #tpu.dot_dimension_numbers<[1], [0], [0], [1], [0, 0, 1, 1], [], []>} : vector<8x784xbf16>, vector<784x128xbf16>, vector<8x128xf32> -> vector<8x128xf32>
    %c0_3 = arith.constant 0 : index
    %c0_4 = arith.constant 0 : index
    %4 = vector.load %arg3[%c0_3, %c0_4] : memref<1x128xf32, #tpu.memory_space<vmem>>, vector<1x128xf32>
    %5 = vector.broadcast %4 : vector<1x128xf32> to vector<8x128xf32>
    %6 = arith.addf %3, %5 : vector<8x128xf32>
    %cst_5 = arith.constant 0.000000e+00 : f32
    %7 = vector.broadcast %cst_5 : f32 to vector<8x128xf32>
    %8 = arith.maximumf %6, %7 : vector<8x128xf32>
    %9 = arith.truncf %8 : vector<8x128xf32> to vector<8x128xbf16>
    %c0_6 = arith.constant 0 : index
    %c0_7 = arith.constant 0 : index
    %10 = vector.load %arg4[%c0_6, %c0_7] : memref<128x128xbf16, #tpu.memory_space<vmem>>, vector<128x128xbf16>
    %cst_8 = arith.constant dense<0.000000e+00> : vector<8x128xf32>
    %11 = tpu.matmul %9, %10, %cst_8 {dimension_numbers = #tpu.dot_dimension_numbers<[1], [0], [0], [1], [0, 0, 1, 1], [], []>} : vector<8x128xbf16>, vector<128x128xbf16>, vector<8x128xf32> -> vector<8x128xf32>
    %c0_9 = arith.constant 0 : index
    %c0_10 = arith.constant 0 : index
    %12 = vector.load %arg5[%c0_9, %c0_10] : memref<1x128xf32, #tpu.memory_space<vmem>>, vector<1x128xf32>
    %13 = vector.broadcast %12 : vector<1x128xf32> to vector<8x128xf32>
    %14 = arith.addf %11, %13 : vector<8x128xf32>
    %cst_11 = arith.constant 0.000000e+00 : f32
    %15 = vector.broadcast %cst_11 : f32 to vector<8x128xf32>
    %16 = arith.maximumf %14, %15 : vector<8x128xf32>
    %17 = arith.truncf %16 : vector<8x128xf32> to vector<8x128xbf16>
    %c0_12 = arith.constant 0 : index
    %c0_13 = arith.constant 0 : index
    %18 = vector.load %arg6[%c0_12, %c0_13] : memref<128x128xbf16, #tpu.memory_space<vmem>>, vector<128x128xbf16>
    %cst_14 = arith.constant dense<0.000000e+00> : vector<8x128xf32>
    %19 = tpu.matmul %17, %18, %cst_14 {dimension_numbers = #tpu.dot_dimension_numbers<[1], [0], [0], [1], [0, 0, 1, 1], [], []>} : vector<8x128xbf16>, vector<128x128xbf16>, vector<8x128xf32> -> vector<8x128xf32>
    %c0_15 = arith.constant 0 : index
    %c0_16 = arith.constant 0 : index
    %20 = vector.load %arg7[%c0_15, %c0_16] : memref<1x128xf32, #tpu.memory_space<vmem>>, vector<1x128xf32>
    %21 = vector.broadcast %20 : vector<1x128xf32> to vector<8x128xf32>
    %22 = arith.addf %19, %21 : vector<8x128xf32>
    %23 = vector.extract_strided_slice %22 {offsets = [0, 0], sizes = [8, 10], strides = [1, 1]} : vector<8x128xf32> to vector<8x10xf32>
    %c0_17 = arith.constant 0 : index
    %c0_18 = arith.constant 0 : index
    %24 = vector.load %arg8[%c0_17, %c0_18] : memref<8x10xf32, #tpu.memory_space<vmem>>, vector<8x10xf32>
    tpu.vector_store %arg8[%c0_17, %c0_18], %23 {strides = array<i32>} : memref<8x10xf32, #tpu.memory_space<vmem>>, vector<8x10xf32>,
    return
  }
  func.func @transform_0(%arg0: i32) -> (i32, i32) {
    %c0_i32 = arith.constant 0 : i32
    %c0_i32_0 = arith.constant 0 : i32
    return %arg0, %c0_i32 : i32, i32
  }
  func.func @transform_1(%arg0: i32) -> (i32, i32) {
    %c0_i32 = arith.constant 0 : i32
    %c0_i32_0 = arith.constant 0 : i32
    %c0_i32_1 = arith.constant 0 : i32
    return %c0_i32, %c0_i32_0 : i32, i32
  }
  func.func @transform_2(%arg0: i32) -> (i32, i32) {
    %c0_i32 = arith.constant 0 : i32
    %c0_i32_0 = arith.constant 0 : i32
    %c0_i32_1 = arith.constant 0 : i32
    return %c0_i32, %c0_i32_0 : i32, i32
  }
  func.func @transform_3(%arg0: i32) -> (i32, i32) {
    %c0_i32 = arith.constant 0 : i32
    %c0_i32_0 = arith.constant 0 : i32
    %c0_i32_1 = arith.constant 0 : i32
    return %c0_i32, %c0_i32_0 : i32, i32
  }
  func.func @transform_4(%arg0: i32) -> (i32, i32) {
    %c0_i32 = arith.constant 0 : i32
    %c0_i32_0 = arith.constant 0 : i32
    %c0_i32_1 = arith.constant 0 : i32
    return %c0_i32, %c0_i32_0 : i32, i32
  }
  func.func @transform_5(%arg0: i32) -> (i32, i32) {
    %c0_i32 = arith.constant 0 : i32
    %c0_i32_0 = arith.constant 0 : i32
    %c0_i32_1 = arith.constant 0 : i32
    return %c0_i32, %c0_i32_0 : i32, i32
  }
  func.func @transform_6(%arg0: i32) -> (i32, i32) {
    %c0_i32 = arith.constant 0 : i32
    %c0_i32_0 = arith.constant 0 : i32
    %c0_i32_1 = arith.constant 0 : i32
    return %c0_i32, %c0_i32_0 : i32, i32
  }
  func.func @transform_7(%arg0: i32) -> (i32, i32) {
    %c0_i32 = arith.constant 0 : i32
    %c0_i32_0 = arith.constant 0 : i32
    return %arg0, %c0_i32 : i32, i32
  }
}

</mosaic_0001>

<bundles_post_ra>
// kernel: tpu_custom_call.1
= control target key start
LH: loop header
LB: loop body
LE: loop exit
PB: predicated region body
PF: predicated region fallthrough
CT: control target
= control target key end

     0   :  { %12 = vsyncpa [#allocation3], 0  ;;  %s1316_s0 = inlined_call_operand.hbm [shape: f32[8,784], index: 0, kind: input, shape index: {}]   ;;  %s1317_s1 = inlined_call_operand.hbm [shape: bf16[784,128], index: 1, kind: input, shape index: {}]   ;;  %s1318_s2 = inlined_call_operand.vmem [shape: f32[1,128], index: 2, kind: input, shape index: {}]   ;;  %s1319_s3 = inlined_call_operand.hbm [shape: bf16[128,128], index: 3, kind: input, shape index: {}]   ;;  %s1320_s4 = inlined_call_operand.vmem [shape: f32[1,128], index: 4, kind: input, shape index: {}]   ;;  %s1321_s5 = inlined_call_operand.hbm [shape: bf16[128,128], index: 5, kind: input, shape index: {}]   ;;  %s1322_s6 = inlined_call_operand.vmem [shape: f32[1,128], index: 6, kind: input, shape index: {}]   ;;  %s1323_s7 = inlined_call_operand.hbm [shape: f32[8,10], index: 7, kind: output, shape index: {}]  }
   0x1   :  { %13 = vsyncpa [#allocation6], 0 }
   0x2   :  { %14 = vsyncpa [#allocation9], 0  ;;  %s31_s26 = sshll.u32 %s1317_s1, 4  ;;  %s32_s26 = int_to_ptr.hbm [resolvable:$true] %s31_s26 }
   0x3   :  { %15 = vsyncpa [#allocation4], 0  ;;  %s1245_s27 = smov [#allocation5]   ;;  %s21_s8 = sshll.u32 %s1316_s0, 4  ;;  %s22_s8 = int_to_ptr.hbm [resolvable:$true] %s21_s8 }
   0x4   :  { %s33_s28 = sshll.u32 %s1245_s27, 4  ;;  %s1246_s9 = smov 64   ;;  %s34_s28 = int_to_ptr.vmem [resolvable:$true] %s33_s28 }
   0x5   :  { %s1247_s10 = smov 4   ;;  %s1248_s11 = smov [#allocation2]  }
   0x6   :  { %39 = dma.hbm_to_vmem [thread:$0]  %s32_s26, 6272, %s34_s28, [#allocation6], %s1246_s9, %s1246_s9, %s1247_s10  }
   0x7   :  { %s23_s12 = sshll.u32 %s1248_s11, 4  ;;  %s46_s15 = sshll.u32 %s1319_s3, 4  ;;  %s24_s12 = int_to_ptr.vmem [resolvable:$true] %s23_s12  ;;  %s47_s15 = int_to_ptr.hbm [resolvable:$true] %s46_s15 }
   0x8   :  { %26 = dma.hbm_to_vmem [thread:$0]  %s22_s8, 896, %s24_s12, [#allocation3]  }
   0x9   :  { %s61_s17 = sshll.u32 %s1321_s5, 4  ;;  %s1249_s18 = smov [#allocation7]   ;;  %s62_s17 = int_to_ptr.hbm [resolvable:$true] %s61_s17 }
   0xa   :  { %s48_s19 = sshll.u32 %s1249_s18, 4  ;;  %s1250_s0 = smov [#allocation8]   ;;  %s49_s19 = int_to_ptr.vmem [resolvable:$true] %s48_s19 }
   0xb   :  { %54 = dma.hbm_to_vmem [thread:$0]  %s47_s15, 1024, %s49_s19, [#allocation6], %s1246_s9, %s1246_s9, %s1247_s10  }
   0xc   :  { %s63_s20 = sshll.u32 %s1250_s0, 4  ;;  %s64_s20 = int_to_ptr.vmem [resolvable:$true] %s63_s20 }
   0xd   :  { %69 = dma.hbm_to_vmem [thread:$0]  %s62_s17, 1024, %s64_s20, [#allocation9], %s1246_s9, %s1246_s9, %s1247_s10  }
   0xe   :  { %1237 = dma.done.wait [#allocation3], 896  }
   0xf   :  { %1238 = vsyncadd [#allocation3], 4294966400 }
  0x10   :  { %1239 = dma.done.wait [#allocation6], 7296  }
  0x11   :  { %1240 = vsyncadd [#allocation6], 4294960000 }
  0x12   :  { %1241 = dma.done.wait [#allocation9], 1024  }
  0x13   :  { %1242 = vsyncadd [#allocation9], 4294966272  ;;  %v1049_v0 = vld [vmem:[#allocation5 + $0x38] sm:$0xff]  ;;  %v1048_v3 = vld [vmem:[#allocation5 + $0x30] sm:$0xff]  ;;  %vm499_vm0 = vcmask 130048   ;;  %s1251_s24 = smov [#allocation10]  }
  0x14   :  { %v1057_v1 = vld [vmem:[#allocation5 + $0x78] sm:$0xff]  ;;  %503 = vmatpush.bf16.msra.mxu0 %v1049_v0  ;;  %v1056_v4 = vld [vmem:[#allocation5 + $0x70] sm:$0xff]  ;;  %v1047_v8 = vld [vmem:[#allocation5 + $0x28] sm:$0xff]  ;;  %s767_s25 = sshll.u32 %s1251_s24, 4  ;;  %s769_s28 = sshll.u32 %s1323_s7, 4  ;;  %vm760_vm1 = vcmask 80896   ;;  %s768_s25 = int_to_ptr.vmem [resolvable:$true] %s767_s25  ;;  %s770_s28 = int_to_ptr.hbm [resolvable:$true] %s769_s28 }
  0x15   :  { %v1065_v2 = vld [vmem:[#allocation5 + $0xb8] sm:$0xff]  ;;  %516 = vmatpush.bf16.msra.mxu1 %v1057_v1  ;;  %v1064_v5 = vld [vmem:[#allocation5 + $0xb0] sm:$0xff]  ;;  %v1055_v9 = vld [vmem:[#allocation5 + $0x68] sm:$0xff] }
  0x16   :  { %529 = vmatpush.bf16.msra.mxu2 %v1065_v2  ;;  %v1073_v6 = vld [vmem:[#allocation5 + $0xf8] sm:$0xff]  ;;  %v1072_v7 = vld [vmem:[#allocation5 + $0xf0] sm:$0xff]  ;;  %v1063_v10 = vld [vmem:[#allocation5 + $0xa8] sm:$0xff] }
  0x17   :  { %542 = vmatpush.bf16.msra.mxu3 %v1073_v6  ;;  %v1071_v11 = vld [vmem:[#allocation5 + $0xe8] sm:$0xff]  ;;  %v1046_v12 = vld [vmem:[#allocation5 + $0x20] sm:$0xff]  ;;  %v1045_v16 = vld [vmem:[#allocation5 + $0x18] sm:$0xff] }
  0x18   :  { %504 = vmatpush.bf16.msra.mxu0 %v1048_v3  ;;  %v1054_v13 = vld [vmem:[#allocation5 + $0x60] sm:$0xff]  ;;  %v1053_v17 = vld [vmem:[#allocation5 + $0x58] sm:$0xff]  ;;  %v1044_v20 = vld [vmem:[#allocation5 + $0x10] sm:$0xff] }
  0x19   :  { %517 = vmatpush.bf16.msra.mxu1 %v1056_v4  ;;  %v1062_v14 = vld [vmem:[#allocation5 + $0xa0] sm:$0xff]  ;;  %v1061_v18 = vld [vmem:[#allocation5 + $0x98] sm:$0xff]  ;;  %v1052_v21 = vld [vmem:[#allocation5 + $0x50] sm:$0xff] }
  0x1a   :  { %530 = vmatpush.bf16.msra.mxu2 %v1064_v5  ;;  %v1070_v15 = vld [vmem:[#allocation5 + $0xe0] sm:$0xff]  ;;  %v1069_v19 = vld [vmem:[#allocation5 + $0xd8] sm:$0xff]  ;;  %v1060_v22 = vld [vmem:[#allocation5 + $0x90] sm:$0xff] }
  0x1b   :  { %543 = vmatpush.bf16.msra.mxu3 %v1072_v7  ;;  %v1068_v23 = vld [vmem:[#allocation5 + $0xd0] sm:$0xff]  ;;  %v1043_v24 = vld [vmem:[#allocation5 + $0x8] sm:$0xff]  ;;  %v1042_v27 = vld [vmem:[#allocation5] sm:$0xff] }
  0x1c   :  { %505 = vmatpush.bf16.msra.mxu0 %v1047_v8  ;;  %v1051_v25 = vld [vmem:[#allocation5 + $0x48] sm:$0xff]  ;;  %v1050_v29 = vld [vmem:[#allocation5 + $0x40] sm:$0xff]  ;;  %v90_v31 = vld [vmem:[#allocation2 + $0x8] sm:$0xff] }
  0x1d   :  { %518 = vmatpush.bf16.msra.mxu1 %v1055_v9  ;;  %v1059_v26 = vld [vmem:[#allocation5 + $0x88] sm:$0xff]  ;;  %v1081_v32 = vld [vmem:[#allocation5 + $0x138] sm:$0xff]  ;;  %v1058_v34 = vld [vmem:[#allocation5 + $0x80] sm:$0xff]  ;;  %v97_v37 = vpack.c.bf16 %v90_v31, %v90_v31 }
  0x1e   :  { %531 = vmatpush.bf16.msra.mxu2 %v1063_v10  ;;  %v1067_v28 = vld [vmem:[#allocation5 + $0xc8] sm:$0xff]  ;;  %v1089_v33 = vld [vmem:[#allocation5 + $0x178] sm:$0xff]  ;;  %v1066_v38 = vld [vmem:[#allocation5 + $0xc0] sm:$0xff] }
  0x1f   :  { %544 = vmatpush.bf16.msra.mxu3 %v1071_v11  ;;  %v89_v30 = vld [vmem:[#allocation2] sm:$0xff]  ;;  %v91_v35 = vld [vmem:[#allocation2 + $0x10] sm:$0xff]  ;;  %v1090_v39 = vld [vmem:[#allocation5 + $0x180] sm:$0xff] }
  0x20   :  { %506 = vmatpush.bf16.msra.mxu0 %v1046_v12  ;;  %v96_v36 = vpack.c.bf16 %v89_v30, %v89_v30  ;;  %v92_v40 = vld [vmem:[#allocation2 + $0x18] sm:$0xff]  ;;  %v1080_v41 = vld [vmem:[#allocation5 + $0x130] sm:$0xff]  ;;  %v98_v43 = vpack.c.bf16 %v91_v35, %v91_v35  ;;  %v1079_v45 = vld [vmem:[#allocation5 + $0x128] sm:$0xff] }
  0x21   :  { %519 = vmatpush.bf16.msra.mxu1 %v1054_v13  ;;  %v1088_v42 = vld [vmem:[#allocation5 + $0x170] sm:$0xff]  ;;  %v99_v44 = vpack.c.bf16 %v92_v40, %v92_v40  ;;  %v1087_v46 = vld [vmem:[#allocation5 + $0x168] sm:$0xff]  ;;  %v1078_v47 = vld [vmem:[#allocation5 + $0x120] sm:$0xff] }
  0x22   :  { %532 = vmatpush.bf16.msra.mxu2 %v1062_v14  ;;  %v1086_v48 = vld [vmem:[#allocation5 + $0x160] sm:$0xff]  ;;  %v1077_v49 = vld [vmem:[#allocation5 + $0x118] sm:$0xff]  ;;  %v1076_v52 = vld [vmem:[#allocation5 + $0x110] sm:$0xff] }
  0x23   :  { %545 = vmatpush.bf16.msra.mxu3 %v1070_v15  ;;  %v1085_v50 = vld [vmem:[#allocation5 + $0x158] sm:$0xff]  ;;  %v1084_v53 = vld [vmem:[#allocation5 + $0x150] sm:$0xff]  ;;  %v1075_v55 = vld [vmem:[#allocation5 + $0x108] sm:$0xff] }
  0x24   :  { %507 = vmatpush.bf16.msra.mxu0 %v1045_v16  ;;  %v95_v51 = vld [vmem:[#allocation2 + $0x30] sm:$0xff]  ;;  %v1083_v56 = vld [vmem:[#allocation5 + $0x148] sm:$0xff]  ;;  %v1074_v57 = vld [vmem:[#allocation5 + $0x100] sm:$0xff] }
  0x25   :  { %520 = vmatpush.bf16.msra.mxu1 %v1053_v17  ;;  %v102_v54 = vpack.c.bf16 %v95_v51, %v95_v51  ;;  %v1082_v58 = vld [vmem:[#allocation5 + $0x140] sm:$0xff]  ;;  %v93_v59 = vld [vmem:[#allocation2 + $0x20] sm:$0xff]  ;;  %v94_v60 = vld [vmem:[#allocation2 + $0x28] sm:$0xff] }
  0x26   :  { %533 = vmatpush.bf16.msra.mxu2 %v1061_v18  ;;  %v100_v61 = vpack.c.bf16 %v93_v59, %v93_v59  ;;  %v101_v62 = vpack.c.bf16 %v94_v60, %v94_v60  ;;  %v1098_v63 = vld [vmem:[#allocation7 + $0x38] sm:$0xff]  ;;  %v1097_v0 = vld [vmem:[#allocation7 + $0x30] sm:$0xff]  ;;  %v1096_v1 = vld [vmem:[#allocation7 + $0x28] sm:$0xff] }
  0x27   :  { %546 = vmatpush.bf16.msra.mxu3 %v1069_v19  ;;  %v1095_v2 = vld [vmem:[#allocation7 + $0x20] sm:$0xff]  ;;  %v1094_v3 = vld [vmem:[#allocation7 + $0x18] sm:$0xff]  ;;  %v1093_v4 = vld [vmem:[#allocation7 + $0x10] sm:$0xff] }
  0x28   :  { %508 = vmatpush.bf16.msra.mxu0 %v1044_v20  ;;  %v1092_v5 = vld [vmem:[#allocation7 + $0x8] sm:$0xff]  ;;  %v1091_v8 = vld [vmem:[#allocation7] sm:$0xff]  ;;  %v1106_v11 = vld [vmem:[#allocation8 + $0x38] sm:$0xff] }
  0x29   :  { %521 = vmatpush.bf16.msra.mxu1 %v1052_v21  ;;  %v1105_v14 = vld [vmem:[#allocation8 + $0x30] sm:$0xff]  ;;  %v1114_v15 = vld [vmem:[%s1318_s2] ss:$0 sm:$0xff]  ;;  %v1104_v16 = vld [vmem:[#allocation8 + $0x28] sm:$0xff] }
  0x2a   :  { %534 = vmatpush.bf16.msra.mxu2 %v1060_v22  ;;  %v1103_v20 = vld [vmem:[#allocation8 + $0x20] sm:$0xff]  ;;  %v1102_v22 = vld [vmem:[#allocation8 + $0x18] sm:$0xff] }
  0x2b   :  { %547 = vmatpush.bf16.msra.mxu3 %v1068_v23 }
  0x2c   :  { %509 = vmatpush.bf16.msra.mxu0 %v1043_v24 }
  0x2d   :  { %522 = vmatpush.bf16.msra.mxu1 %v1051_v25  ;;  %v1101_v25 = vld [vmem:[#allocation8 + $0x10] sm:$0xff] }
  0x2e   :  { %535 = vmatpush.bf16.msra.mxu2 %v1059_v26 }
  0x2f   :  { %548 = vmatpush.bf16.msra.mxu3 %v1067_v28 }
  0x30   :  { %510 = vmatpush.bf16.msra.mxu0 %v1042_v27 }
  0x31   :  { %523 = vmatpush.bf16.msra.mxu1 %v1050_v29 }
  0x32   :  { %536 = vmatpush.bf16.msra.mxu2 %v1058_v34 }
  0x33   :  { %511 = vmatmul.bf16.vlgmr.msra.gmra.mxu0 %v96_v36  ;;  %549 = vmatpush.bf16.msra.mxu3 %v1066_v38  ;;  %v1099_v38 = vld [vmem:[#allocation8] sm:$0xff] }
  0x34   :  { %555 = vmatpush.bf16.msrb.mxu0 %v1081_v32  ;;  %524 = vmatmul.bf16.vlgmr.msra.gmra.mxu1 %v97_v37  ;;  %v1100_v37 = vld [vmem:[#allocation8 + $0x8] sm:$0xff] }
  0x35   :  { %568 = vmatpush.bf16.msrb.mxu1 %v1089_v33  ;;  %537 = vmatmul.bf16.vlgmr.msra.gmra.mxu2 %v98_v43 }
  0x36   :  { %588 = vmatpush.bf16.msrb.mxu2 %v1090_v39  ;;  %550 = vmatmul.bf16.vlgmr.msra.gmra.mxu3 %v99_v44  ;;  %v1115_v39 = vld [vmem:[%s1320_s4] ss:$0 sm:$0xff] }
  0x37   :  { %664 = vmatpush.bf16.msrb.mxu3 %v1098_v63 }
  0x38   :  { %556 = vmatpush.bf16.msrb.mxu0 %v1080_v41 }
  0x39   :  { %569 = vmatpush.bf16.msrb.mxu1 %v1088_v42 }
  0x3a   :  { %747 = vmatpush.bf16.msra.mxu2 %v1106_v11 }
  0x3b   :  { %665 = vmatpush.bf16.msrb.mxu3 %v1097_v0 }
  0x3c   :  { %557 = vmatpush.bf16.msrb.mxu0 %v1079_v45  ;;  %v1116_v45 = vld [vmem:[%s1322_s6] ss:$0 sm:$0xff] }
  0x3d   :  { %570 = vmatpush.bf16.msrb.mxu1 %v1087_v46 }
  0x3e   :  { %748 = vmatpush.bf16.msra.mxu2 %v1105_v14 }
  0x3f   :  { %666 = vmatpush.bf16.msrb.mxu3 %v1096_v1 }
  0x40   :  { %558 = vmatpush.bf16.msrb.mxu0 %v1078_v47 }
  0x41   :  { %571 = vmatpush.bf16.msrb.mxu1 %v1086_v48 }
  0x42   :  { %749 = vmatpush.bf16.msra.mxu2 %v1104_v16 }
  0x43   :  { %667 = vmatpush.bf16.msrb.mxu3 %v1095_v2 }
  0x44   :  { %559 = vmatpush.bf16.msrb.mxu0 %v1077_v49 }
  0x45   :  { %572 = vmatpush.bf16.msrb.mxu1 %v1085_v50  ;;  %977 = vmatmul.msk.bf16.vlgmr.msrb.gmra.mxu2 %vm499_vm0, %v102_v54 }
  0x46   :  { %750 = vmatpush.bf16.msra.mxu2 %v1103_v20 }
  0x47   :  { %668 = vmatpush.bf16.msrb.mxu3 %v1094_v3 }
  0x48   :  { %560 = vmatpush.bf16.msrb.mxu0 %v1076_v52 }
  0x49   :  { %573 = vmatpush.bf16.msrb.mxu1 %v1084_v53 }
  0x4a   :  { %751 = vmatpush.bf16.msra.mxu2 %v1102_v22 }
  0x4b   :  { %669 = vmatpush.bf16.msrb.mxu3 %v1093_v4 }
  0x4c   :  { %561 = vmatpush.bf16.msrb.mxu0 %v1075_v55 }
  0x4d   :  { %574 = vmatpush.bf16.msrb.mxu1 %v1083_v56 }
  0x4e   :  { %752 = vmatpush.bf16.msra.mxu2 %v1101_v25 }
  0x4f   :  { %670 = vmatpush.bf16.msrb.mxu3 %v1092_v5 }
  0x50   :  { %562 = vmatpush.bf16.msrb.mxu0 %v1074_v57 }
  0x51   :  { %575 = vmatpush.bf16.msrb.mxu1 %v1082_v58 }
  0x52   :  { %753 = vmatpush.bf16.msra.mxu2 %v1100_v37 }
  0x53   :  { %563 = vmatmul.bf16.vlgmr.msrb.gmra.mxu0 %v100_v61  ;;  %671 = vmatpush.bf16.msrb.mxu3 %v1091_v8 }
  0x54   :  { %576 = vmatmul.bf16.vlgmr.msrb.gmra.mxu1 %v101_v62 }
  0x56   :  { %754 = vmatpush.bf16.msra.mxu2 %v1099_v38 }
  0xb0   :  { %v512_v6 = vpop.f32.mrf.mxu0 }
  0xb1   :  { %v525_v7 = vpop.f32.mrf.mxu1  ;;  %v513_v17 = vadd.f32 %v1114_v15, %v512_v6 }
  0xb3   :  { %v526_v21 = vadd.f32 %v525_v7, %v513_v17 }
  0xb8   :  { %v514_v9 = vpop.f32.mrf.mxu0  ;;  %v538_v12 = vpop.f32.mrf.mxu2 }
  0xb9   :  { %v527_v10 = vpop.f32.mrf.mxu1  ;;  %v551_v13 = vpop.f32.mrf.mxu3  ;;  %v539_v23 = vadd.f32 %v538_v12, %v526_v21 }
  0xbb   :  { %v552_v26 = vadd.f32 %v551_v13, %v539_v23 }
  0xc0   :  { %v540_v18 = vpop.f32.mrf.mxu2 }
  0xc1   :  { %v553_v19 = vpop.f32.mrf.mxu3 }
  0xc8   :  { %v590_v24 = vpop.f32.mrf.mxu2 }
  0xd0   :  { %v564_v27 = vpop.f32.mrf.mxu0  ;;  %v592_v31 = vpop.f32.mrf.mxu2 }
  0xd1   :  { %v577_v28 = vpop.f32.mrf.mxu1  ;;  %v565_v29 = vadd.f32 %v564_v27, %v552_v26 }
  0xd3   :  { %v578_v30 = vadd.f32 %v577_v28, %v565_v29 }
  0xd5   :  { %v591_v32 = vadd.f32 %v590_v24, %v578_v30 }
  0xd7   :  { %v594_v33 = vmax.f32 %v591_v32, 0.0 }
  0xd8   :  { %v566_v34 = vpop.f32.mrf.mxu0 }
  0xd9   :  { %v579_v35 = vpop.f32.mrf.mxu1  ;;  %v595_v36 = vpack.c.bf16 %v594_v33, %v594_v33 }
  0xdb   :  { %672 = vmatmul.bf16.vlgmr.msrb.gmra.mxu3 %v595_v36 }
 0x15e   :  { %v673_v40 = vpop.f32.mrf.mxu3 }
 0x15f   :  { %v674_v41 = vadd.f32 %v1115_v39, %v673_v40 }
 0x161   :  { %v677_v42 = vmax.f32 %v674_v41, 0.0 }
 0x163   :  { %v678_v43 = vpack.c.bf16 %v677_v42, %v677_v42 }
 0x165   :  { %755 = vmatmul.bf16.vlgmr.msra.gmra.mxu2 %v678_v43 }
 0x166   :  { %v675_v44 = vpop.f32.mrf.mxu3 }
 0x1e8   :  { %v756_v46 = vpop.f32.mrf.mxu2 }
 0x1e9   :  { %v757_v47 = vadd.f32 %v1116_v45, %v756_v46 }
 0x1eb   :  { %761 = vst.msk [vmem:[#allocation10] sm:$0xff] %vm760_vm1, %v757_v47 }
 0x1ec   :  { %772 = dma.vmem_to_hbm [thread:$0]  %s768_s25, 128, %s770_s28, [#allocation4]  }
 0x1f0   :  { %v758_v48 = vpop.f32.mrf.mxu2 }
 0x1f1   :  { %1243 = dma.done.wait [#allocation4], 128  }
 0x1f2   :  { %1244 = vsyncadd [#allocation4], 4294967168 }
 0x1f3   :  { %777 = vsyncpa [#allocation3], 1 }
 0x1f4   :  { %778 = vsyncpa [#allocation6], 1 }
 0x1f5   :  { %779 = vsyncpa [#allocation9], 1 }
 0x1f6   :  { %780 = vsyncpa [#allocation4], 1 }

</bundles_post_ra>
